<compile_context>
chip_gen: v6e
topology: v6e:2x2x1
jax: 0.10.0
libtpu: 0.0.40
codegen_flags: <defaults>
</compile_context>

<pallas_src>
from functools import partial

import jax
import jax.numpy as jnp
from jax.experimental import pallas as pl
from jax.experimental.pallas import tpu as pltpu

_LANE = 128   # lane width (hidden-channel padding granularity)


def _round_up(x, m):
    return (x + m - 1) // m * m


def _pick_tile_r(rows):
    """Largest row tile (<=512, multiple of 128) keeping >=4 grid steps if possible."""
    if rows % 128 != 0:
        # TODO(synk): ragged row counts need a masked final tile.
        raise ValueError(f"B*H*W={rows} must be a multiple of 128")
    for min_steps in (4, 2, 1):
        for cand in (512, 384, 256, 128):
            if rows % cand == 0 and rows // cand >= min_steps:
                return cand
    return 128


# ----------------------------------------------------------------------------
# Fused generator + MSE kernel (one grid step = one row-tile of the im2col mat)
# ----------------------------------------------------------------------------
def _gen_mse_kernel(patches_ref, tgt_ref, w1_ref, b1_ref, w2_ref, b2_ref,
                    *out_refs, want_pred: bool):
    # patches_ref : (TR, K)          bf16  im2col rows (true K = 9*Cin, no pad)
    # tgt_ref     : (TR, Cout)       bf16  targets at true channel width
    # w1_ref      : (K, Cmid_pad)    bf16  resident
    # b1_ref      : (1, Cmid_pad)    f32
    # w2_ref      : (Cmid_pad, Cout) bf16  resident
    # b2_ref      : (1, Cout)        f32
    # out_refs    : test  -> (pred_ref (TR,Cout) bf16, partial_ref (1,1,Cout) f32)
    #               train -> (partial_ref,)
    h = jnp.dot(patches_ref[...], w1_ref[...],
                preferred_element_type=jnp.float32) + b1_ref[...]
    h = jnp.maximum(h, 0.0)                            # ReLU in f32 on the VPU
    out = jnp.dot(h.astype(w2_ref.dtype), w2_ref[...],
                  preferred_element_type=jnp.float32) + b2_ref[...]

    if want_pred:
        pred_ref, partial_ref = out_refs
        pred_ref[...] = out.astype(pred_ref.dtype)     # bf16, true width
    else:
        (partial_ref,) = out_refs                      # train: loss only

    # Fused criterion: per-lane SSE partial.  No padded lanes exist (out and
    # tgt are both true-width), so no masking / zero-lane invariant is needed.
    d = out - tgt_ref[...].astype(jnp.float32)
    sse = jnp.sum(d * d, axis=0, keepdims=True)        # (1, Cout) column sums
    partial_ref[...] = sse[None]                       # (1, 1, Cout)


# ----------------------------------------------------------------------------
# Wrapper: im2col glue + single fused pallas_call
# ----------------------------------------------------------------------------
@partial(jax.jit, static_argnames=("want_pred",))
def _fused_forward(x_nchw, tgt_nchw, w1, b1, w2, b2, *, want_pred):
    B, cin, H, W = x_nchw.shape
    rows = B * H * W
    tile_r = _pick_tile_r(rows)
    num_tiles = rows // tile_r
    k_raw, cmid_pad = w1.shape
    cout = w2.shape[1]

    # --- im2col in plain-JAX glue: one K-dense matmul replaces nine K=Cin taps.
    # TODO(synk): move this into the kernel (halo row-blocks) to cut the HBM trip.
    x = jnp.transpose(x_nchw, (0, 2, 3, 1))                        # NHWC
    xp = jnp.pad(x, ((0, 0), (1, 1), (1, 1), (0, 0)))              # 'same' halo
    taps = [xp[:, kh:kh + H, kw:kw + W, :] for kh in range(3) for kw in range(3)]
    patches = jnp.concatenate(taps, axis=-1).reshape(rows, k_raw).astype(jnp.bfloat16)

    tgt = jnp.transpose(tgt_nchw, (0, 2, 3, 1)).reshape(rows, cout).astype(jnp.bfloat16)

    grid = (num_tiles,)
    flops = 2 * rows * (k_raw * cmid_pad + cmid_pad * cout)
    bytes_accessed = (patches.size * 2 + tgt.size * 2
                      + (rows * cout * 2 if want_pred else 0)
                      + w1.size * 2 + w2.size * 2 + (b1.size + b2.size) * 4
                      + num_tiles * cout * 4)

    in_specs = [
        pl.BlockSpec((tile_r, k_raw), lambda i: (i, 0)),      # patches (contiguous rows)
        pl.BlockSpec((tile_r, cout), lambda i: (i, 0)),       # targets (true width, bf16)
        pl.BlockSpec((k_raw, cmid_pad), lambda i: (0, 0)),    # w1 (resident)
        pl.BlockSpec((1, cmid_pad), lambda i: (0, 0)),        # b1
        pl.BlockSpec((cmid_pad, cout), lambda i: (0, 0)),     # w2 (resident)
        pl.BlockSpec((1, cout), lambda i: (0, 0)),            # b2
    ]
    partial_shape = jax.ShapeDtypeStruct((num_tiles, 1, cout), jnp.float32)
    partial_spec = pl.BlockSpec((1, 1, cout), lambda i: (i, 0, 0))
    cparams = pltpu.CompilerParams(
        dimension_semantics=("parallel",),      # row tiles shard across TCs (v7x)
        vmem_limit_bytes=32 * 1024 * 1024,      # safe on 64 MiB (v7x) and 128 MiB
    )
    cost = pl.CostEstimate(flops=flops, transcendentals=0,
                           bytes_accessed=bytes_accessed)

    if want_pred:
        pred_flat, partials = pl.pallas_call(
            partial(_gen_mse_kernel, want_pred=True),
            out_shape=(
                jax.ShapeDtypeStruct((rows, cout), jnp.bfloat16),   # preds (true width)
                partial_shape,
            ),
            grid_spec=pltpu.PrefetchScalarGridSpec(
                num_scalar_prefetch=0, grid=grid, in_specs=in_specs,
                out_specs=(
                    pl.BlockSpec((tile_r, cout), lambda i: (i, 0)),
                    partial_spec,
                ),
            ),
            compiler_params=cparams, cost_estimate=cost,
        )(patches, tgt, w1, b1, w2, b2)
    else:
        # Loss-only variant: predictions are never written to HBM in train mode.
        partials = pl.pallas_call(
            partial(_gen_mse_kernel, want_pred=False),
            out_shape=partial_shape,
            grid_spec=pltpu.PrefetchScalarGridSpec(
                num_scalar_prefetch=0, grid=grid, in_specs=in_specs,
                out_specs=partial_spec,
            ),
            compiler_params=cparams, cost_estimate=cost,
        )(patches, tgt, w1, b1, w2, b2)
        pred_flat = None

    loss = jnp.sum(partials) / (rows * cout)   # MSE 'mean' over real elements

    if want_pred:
        preds_nchw = jnp.transpose(
            pred_flat.astype(jnp.float32).reshape(B, H, W, cout), (0, 3, 1, 2))
        return preds_nchw, loss
    return loss


# ----------------------------------------------------------------------------
# Module wrapper mirroring TrainingModel.forward
# ----------------------------------------------------------------------------
class TrainingModelPallas:
    """JAX/Pallas equivalent of TrainingModel (generator + criterion wrapper)."""

    mode_list = ["train", "train-rm", "test"]

    def __init__(self, params):
        w1, b1, w2, b2 = params               # (3,3,Cin,Cmid), (1,Cmid), (Cmid,Cout), (1,Cout)
        cin, cmid = w1.shape[2], w1.shape[3]
        cout = w2.shape[1]
        k_raw = 9 * cin
        cmid_pad = _round_up(cmid, _LANE)
        # True-K / true-Cout weights; hidden dim padded to a full 128-lane tile so
        # the first matmul output is lane-dense.  Padded / bf16-cast ONCE here and
        # reused across every forward call.  (bf16 MXU operands => ~1e-2 relative
        # drift vs an f32 PyTorch reference.)
        self.w1 = jnp.zeros((k_raw, cmid_pad), jnp.bfloat16).at[:, :cmid].set(
            w1.reshape(k_raw, cmid).astype(jnp.bfloat16))
        self.b1 = jnp.zeros((1, cmid_pad), jnp.float32).at[:, :cmid].set(b1)
        self.w2 = jnp.zeros((cmid_pad, cout), jnp.bfloat16).at[:cmid, :].set(
            w2.astype(jnp.bfloat16))
        self.b2 = b2.astype(jnp.float32).reshape(1, cout)

    def forward(self, inputs, targets, meta_info=None, mode=None):
        if mode == "train":
            loss = _fused_forward(inputs["img"], targets["heatmap"],
                                  self.w1, self.b1, self.w2, self.b2,
                                  want_pred=False)
            return {"loss": loss}
        elif mode == "test":
            pred, mse = _fused_forward(inputs["img"], targets["heatmap"],
                                       self.w1, self.b1, self.w2, self.b2,
                                       want_pred=True)
            preds = {"pred": pred}
            preds.update(inputs)  # mirrors `preds.update(inputs)` in the reference
            return {"pred": preds["pred"], "mse": mse}
        else:
            raise KeyError(
                f"arg `mode` should be one of {self.mode_list} but got {mode} !")

    __call__ = forward


def _init_params(key, cin, cmid, cout):
    k1, k2, k3, k4 = jax.random.split(key, 4)
    w1 = jax.random.normal(k1, (3, 3, cin, cmid), jnp.float32) * 0.1
    b1 = jax.random.normal(k2, (1, cmid), jnp.float32) * 0.01
    w2 = jax.random.normal(k3, (cmid, cout), jnp.float32) * 0.1
    b2 = jax.random.normal(k4, (1, cout), jnp.float32) * 0.01
    return (w1, b1, w2, b2)


if __name__ == "__main__":
    B, Cin, H, W = 2, 4, 16, 16
    Cmid, Cout = 8, 4

    root = jax.random.PRNGKey(0)
    k_img, k_tgt, k_par = jax.random.split(root, 3)

    inputs = {"img": jax.random.normal(k_img, (B, Cin, H, W), jnp.float32)}
    targets = {"heatmap": jax.random.normal(k_tgt, (B, Cout, H, W), jnp.float32)}
    meta_info = {}

    model = TrainingModelPallas(_init_params(k_par, Cin, Cmid, Cout))

    train_out = model(inputs, targets, meta_info, mode="train")
    test_out = model(inputs, targets, meta_info, mode="test")

    jax.block_until_ready(train_out["loss"])
    jax.block_until_ready(test_out["pred"])
    jax.block_until_ready(test_out["mse"])

    print("KERNEL_OK")
</pallas_src>

<mosaic_0001>
module attributes {stable_mosaic.version = 11 : i64} {
  func.func @_gen_mse_kernel(%arg0: i32, %arg1: memref<128x36xbf16, #tpu.memory_space<vmem>>, %arg2: memref<128x4xbf16, #tpu.memory_space<vmem>>, %arg3: memref<36x128xbf16, #tpu.memory_space<vmem>>, %arg4: memref<1x128xf32, #tpu.memory_space<vmem>>, %arg5: memref<128x4xbf16, #tpu.memory_space<vmem>>, %arg6: memref<1x4xf32, #tpu.memory_space<vmem>>, %arg7: memref<1x1x4xf32, #tpu.memory_space<vmem>>) attributes {dimension_semantics = [#tpu.dimension_semantics<parallel>], iteration_bounds = array<i64: 4>, scalar_prefetch = 0 : i64, scratch_operands = 0 : i64, tpu.core_type = #tpu.core_type<tc>, window_params = [{transform_indices = @transform_0, window_bounds = array<i64: 128, 36>}, {transform_indices = @transform_1, window_bounds = array<i64: 128, 4>}, {pipeline_mode = #tpu.pipeline_mode<synchronous>, transform_indices = @transform_2, window_bounds = array<i64: 36, 128>}, {pipeline_mode = #tpu.pipeline_mode<synchronous>, transform_indices = @transform_3, window_bounds = array<i64: 1, 128>}, {pipeline_mode = #tpu.pipeline_mode<synchronous>, transform_indices = @transform_4, window_bounds = array<i64: 128, 4>}, {pipeline_mode = #tpu.pipeline_mode<synchronous>, transform_indices = @transform_5, window_bounds = array<i64: 1, 4>}, {transform_indices = @transform_6, window_bounds = array<i64: 1, 1, 4>}]} {
    %c0 = arith.constant 0 : index
    %c0_0 = arith.constant 0 : index
    %0 = vector.load %arg1[%c0, %c0_0] : memref<128x36xbf16, #tpu.memory_space<vmem>>, vector<128x36xbf16>
    %c0_1 = arith.constant 0 : index
    %c0_2 = arith.constant 0 : index
    %1 = vector.load %arg3[%c0_1, %c0_2] : memref<36x128xbf16, #tpu.memory_space<vmem>>, vector<36x128xbf16>
    %cst = arith.constant dense<0.000000e+00> : vector<128x128xf32>
    %2 = tpu.matmul %0, %1, %cst {dimension_numbers = #tpu.dot_dimension_numbers<[1], [0], [0], [1], [0, 0, 1, 1], [], []>} : vector<128x36xbf16>, vector<36x128xbf16>, vector<128x128xf32> -> vector<128x128xf32>
    %c0_3 = arith.constant 0 : index
    %c0_4 = arith.constant 0 : index
    %3 = vector.load %arg4[%c0_3, %c0_4] : memref<1x128xf32, #tpu.memory_space<vmem>>, vector<1x128xf32>
    %4 = vector.broadcast %3 : vector<1x128xf32> to vector<128x128xf32>
    %5 = arith.addf %2, %4 : vector<128x128xf32>
    %cst_5 = arith.constant 0.000000e+00 : f32
    %6 = vector.broadcast %cst_5 : f32 to vector<128x128xf32>
    %7 = arith.maximumf %5, %6 : vector<128x128xf32>
    %8 = arith.truncf %7 : vector<128x128xf32> to vector<128x128xbf16>
    %c0_6 = arith.constant 0 : index
    %c0_7 = arith.constant 0 : index
    %9 = vector.load %arg5[%c0_6, %c0_7] : memref<128x4xbf16, #tpu.memory_space<vmem>>, vector<128x4xbf16>
    %cst_8 = arith.constant dense<0.000000e+00> : vector<128x4xf32>
    %10 = tpu.matmul %8, %9, %cst_8 {dimension_numbers = #tpu.dot_dimension_numbers<[1], [0], [0], [1], [0, 0, 1, 1], [], []>} : vector<128x128xbf16>, vector<128x4xbf16>, vector<128x4xf32> -> vector<128x4xf32>
    %c0_9 = arith.constant 0 : index
    %c0_10 = arith.constant 0 : index
    %11 = vector.load %arg6[%c0_9, %c0_10] : memref<1x4xf32, #tpu.memory_space<vmem>>, vector<1x4xf32>
    %12 = vector.broadcast %11 : vector<1x4xf32> to vector<128x4xf32>
    %13 = arith.addf %10, %12 : vector<128x4xf32>
    %c0_11 = arith.constant 0 : index
    %c0_12 = arith.constant 0 : index
    %14 = vector.load %arg2[%c0_11, %c0_12] : memref<128x4xbf16, #tpu.memory_space<vmem>>, vector<128x4xbf16>
    %15 = arith.extf %14 : vector<128x4xbf16> to vector<128x4xf32>
    %16 = arith.subf %13, %15 : vector<128x4xf32>
    %17 = arith.mulf %16, %16 : vector<128x4xf32>
    %cst_13 = arith.constant dense<0.000000e+00> : vector<4xf32>
    %18 = vector.multi_reduction <add>, %17, %cst_13 [0] : vector<128x4xf32> to vector<4xf32>
    %19 = vector.shape_cast %18 : vector<4xf32> to vector<1x4xf32>
    %20 = vector.shape_cast %19 : vector<1x4xf32> to vector<1x1x4xf32>
    %c0_14 = arith.constant 0 : index
    %c0_15 = arith.constant 0 : index
    %c0_16 = arith.constant 0 : index
    %21 = vector.load %arg7[%c0_14, %c0_15, %c0_16] : memref<1x1x4xf32, #tpu.memory_space<vmem>>, vector<1x1x4xf32>
    tpu.vector_store %arg7[%c0_14, %c0_15, %c0_16], %20 {strides = array<i32>} : memref<1x1x4xf32, #tpu.memory_space<vmem>>, vector<1x1x4xf32>,
    return
  }
  func.func @transform_0(%arg0: i32) -> (i32, i32) {
    %c0_i32 = arith.constant 0 : i32
    %c0_i32_0 = arith.constant 0 : i32
    return %arg0, %c0_i32 : i32, i32
  }
  func.func @transform_1(%arg0: i32) -> (i32, i32) {
    %c0_i32 = arith.constant 0 : i32
    %c0_i32_0 = arith.constant 0 : i32
    return %arg0, %c0_i32 : i32, i32
  }
  func.func @transform_2(%arg0: i32) -> (i32, i32) {
    %c0_i32 = arith.constant 0 : i32
    %c0_i32_0 = arith.constant 0 : i32
    %c0_i32_1 = arith.constant 0 : i32
    return %c0_i32, %c0_i32_0 : i32, i32
  }
  func.func @transform_3(%arg0: i32) -> (i32, i32) {
    %c0_i32 = arith.constant 0 : i32
    %c0_i32_0 = arith.constant 0 : i32
    %c0_i32_1 = arith.constant 0 : i32
    return %c0_i32, %c0_i32_0 : i32, i32
  }
  func.func @transform_4(%arg0: i32) -> (i32, i32) {
    %c0_i32 = arith.constant 0 : i32
    %c0_i32_0 = arith.constant 0 : i32
    %c0_i32_1 = arith.constant 0 : i32
    return %c0_i32, %c0_i32_0 : i32, i32
  }
  func.func @transform_5(%arg0: i32) -> (i32, i32) {
    %c0_i32 = arith.constant 0 : i32
    %c0_i32_0 = arith.constant 0 : i32
    %c0_i32_1 = arith.constant 0 : i32
    return %c0_i32, %c0_i32_0 : i32, i32
  }
  func.func @transform_6(%arg0: i32) -> (i32, i32, i32) {
    %c0_i32 = arith.constant 0 : i32
    %c0_i32_0 = arith.constant 0 : i32
    %c0_i32_1 = arith.constant 0 : i32
    return %arg0, %c0_i32, %c0_i32_0 : i32, i32, i32
  }
}

</mosaic_0001>

<bundles_post_ra>
// kernel: _fused_forward.1
= control target key start
LH: loop header
LB: loop body
LE: loop exit
PB: predicated region body
PF: predicated region fallthrough
CT: control target
= control target key end

     0   :  { %s1084_s21 = smov 0   ;;  %s1217_s0 = inlined_call_operand.vmem [shape: bf16[512,36], index: 0, kind: input, shape index: {}]   ;;  %s1218_s1 = inlined_call_operand.vmem [shape: bf16[512,4], index: 1, kind: input, shape index: {}]   ;;  %s1219_s2 = inlined_call_operand.vmem [shape: bf16[36,128], index: 2, kind: input, shape index: {}]   ;;  %s1220_s3 = inlined_call_operand.vmem [shape: f32[1,128], index: 3, kind: input, shape index: {}]   ;;  %s1221_s4 = inlined_call_operand.vmem [shape: bf16[128,4], index: 4, kind: input, shape index: {}]   ;;  %s1222_s5 = inlined_call_operand.vmem [shape: f32[1,4], index: 5, kind: input, shape index: {}]   ;;  %s1223_s6 = inlined_call_operand.vmem [shape: f32[4,1,4], index: 6, kind: output, shape index: {}]  }
   0x1 LB: > { %s1090_s22 = sadd.s32 4294967295, %s1047_s21   ;;  %p841_p0 = scmp.ge.s32.totalorder %s1047_s21, 1  ;;  %s1047_s21 = sphi %s1084_s21, %s16_s21  }
   0x2   : > { %p224_p1 = scmp.lt.s32.totalorder %s1047_s21, 5 }
   0x4   : > { %p225_p2 = pnand %p841_p0, %p224_p1 }
   0x5   : > { %s842_s27 = sshll.u32 (!%p225_p2), %s1090_s22, 4  ;;  %p269_p4 = scmp.lt.s32.totalorder (!%p225_p2), %s1090_s22, 3 }
   0x6   : > { %228 = sbr.rel (%p225_p2) target bundleno = 479 (0x1df), region = 44  ;;  %p258_p3 = scmp.lt.s32.totalorder (!%p225_p2), %s842_s27, 63 }
   0xb   : > { %v1022_v0 = vld [vmem:[%s1219_s2 + $0x10] ss:$0 sps:$4 sm:$0x33]   ;;  %vm381_vm0 = vcmask 1041408   ;;  %v1023_v1 = vld [vmem:[%s1219_s2 + $0x8] sm:$0xff]   ;;  %v1024_v3 = vld [vmem:[%s1219_s2] sm:$0xff]  }
   0xc   : > { %1013 = vmatprep.subr.msk.bf16.mxu0 %vm381_vm0, %v1022_v0  ;;  %v383_v2 = vsel %vm381_vm0, %v1022_v0, 0  ;;  %v1033_v4 = vld [vmem:[%s1221_s4 + $0x38] sm:$0xff]   ;;  %s1225_s27 = smov (!%p258_p3, %s842_s27), 63  ;;  %v1034_v5 = vld [vmem:[%s1221_s4 + $0x30] sm:$0xff]   ;;  %vm356_vm1 = vcmask 293888   ;;  %v1035_v7 = vld [vmem:[%s1221_s4 + $0x28] sm:$0xff]  }
   0xd   : > { %944 = vmatpush3.bf16.msra.mxu0 %v383_v2  ;;  %997 = vmatprep.subr.bf16.mxu1 %v1033_v4  ;;  %s843_s10 = sshll.u32 %s1225_s27, 2  ;;  %v1036_v10 = vld [vmem:[%s1221_s4 + $0x20] sm:$0xff]   ;;  %v1037_v13 = vld [vmem:[%s1221_s4 + $0x18] sm:$0xff]   ;;  %v1038_v17 = vld [vmem:[%s1221_s4 + $0x10] sm:$0xff]   ;;  %vm738_vm2 = vcmask 31744   ;;  %s1227_s22 = smov (!%p269_p4, %s1090_s22), 3 }
   0xe   : > { %945 = vmatprep.subr.bf16.mxu0 %v1023_v1  ;;  %1005 = vmatpush3.bf16.msra.mxu1 %v1033_v4  ;;  %s1118_s13 = scalar_lea.vmem %s1217_s0, %s843_s10  ;;  %v1039_v18 = vld [vmem:[%s1221_s4 + $0x8] sm:$0xff]   ;;  %v1040_v19 = vld [vmem:[%s1221_s4] sm:$0xff]   ;;  %s1162_s9 = scalar_lea.vmem %s1218_s1, %s843_s10  ;;  %vm776_vm3 = vcmask 24576  }
   0xf   : > { %998 = vmatprep.subr.bf16.mxu1 %v1034_v5  ;;  %v1025_v6 = vld [vmem:[%s1118_s13] sm:$0xff]   ;;  %v1026_v8 = vld [vmem:[%s1118_s13 + $0x8] sm:$0xff]   ;;  %v1027_v9 = vld [vmem:[%s1118_s13 + $0x10] sm:$0xff]  }
  0x10   : > { %949 = vmatprep.mubr.msk.bf16.mxu0 %vm356_vm1, %v1025_v6  ;;  %v1028_v11 = vld [vmem:[%s1118_s13 + $0x18] sm:$0xff]   ;;  %v1029_v12 = vld [vmem:[%s1118_s13 + $0x20] sm:$0xff]   ;;  %v1030_v14 = vld [vmem:[%s1118_s13 + $0x28] sm:$0xff]  }
  0x11   : > { %946 = vmatpush3.bf16.msra.mxu0 %v1023_v1  ;;  %v1031_v15 = vld [vmem:[%s1118_s13 + $0x30] sm:$0xff]   ;;  %v1032_v16 = vld [vmem:[%s1118_s13 + $0x38] sm:$0xff]   ;;  %v846_v22 = vld [vmem:[%s1220_s3] ss:$0 sm:$0xff]  ;;  %s271_s13 = scalar_lea.vmem %s1223_s6, %s1227_s22 }
  0x12   : > { %947 = vmatprep.subr.bf16.mxu0 %v1024_v3  ;;  %1006 = vmatpush3.bf16.msra.mxu1 %v1034_v5 }
  0x13   : > { %999 = vmatprep.subr.bf16.mxu1 %v1035_v7 }
  0x15   : > { %948 = vmatpush3.bf16.msra.mxu0 %v1024_v3 }
  0x16   : > { %965 = vmatprep.subr.bf16.mxu0 %v1033_v4  ;;  %1007 = vmatpush3.bf16.msra.mxu1 %v1035_v7 }
  0x17   : > { %1000 = vmatprep.subr.bf16.mxu1 %v1036_v10 }
  0x18   : > { %950 = vmatmul.mubr.msk.bf16.vlgmr.msra.gmra.mxu0 %vm356_vm1, %v1026_v8 }
  0x19   : > { %953 = vmatprep.mubr.msk.bf16.mxu0 %vm356_vm1, %v1027_v9  ;;  %966 = vmatpush3.bf16.msra.mxu0 %v1033_v4 }
  0x1a   : > { %967 = vmatprep.subr.bf16.mxu0 %v1034_v5  ;;  %1008 = vmatpush3.bf16.msra.mxu1 %v1036_v10 }
  0x1b   : > { %1001 = vmatprep.subr.bf16.mxu1 %v1037_v13 }
  0x1d   : > { %968 = vmatpush3.bf16.msra.mxu0 %v1034_v5 }
  0x1e   : > { %969 = vmatprep.subr.bf16.mxu0 %v1035_v7  ;;  %1009 = vmatpush3.bf16.msra.mxu1 %v1037_v13 }
  0x1f   : > { %1002 = vmatprep.subr.bf16.mxu1 %v1038_v17 }
  0x20   : > { %954 = vmatmul.mubr.msk.bf16.gmra.mxu0 %vm356_vm1, %v1028_v11 }
  0x21   : > { %957 = vmatprep.mubr.msk.bf16.mxu0 %vm356_vm1, %v1029_v12  ;;  %970 = vmatpush3.bf16.msra.mxu0 %v1035_v7 }
  0x22   : > { %971 = vmatprep.subr.bf16.mxu0 %v1036_v10  ;;  %1010 = vmatpush3.bf16.msra.mxu1 %v1038_v17 }
  0x23   : > { %1003 = vmatprep.subr.bf16.mxu1 %v1039_v18 }
  0x25   : > { %972 = vmatpush3.bf16.msra.mxu0 %v1036_v10 }
  0x26   : > { %973 = vmatprep.subr.bf16.mxu0 %v1037_v13  ;;  %1011 = vmatpush3.bf16.msra.mxu1 %v1039_v18 }
  0x27   : > { %1004 = vmatprep.subr.bf16.mxu1 %v1040_v19 }
  0x28   : > { %958 = vmatmul.mubr.msk.bf16.gmra.mxu0 %vm356_vm1, %v1030_v14 }
  0x29   : > { %961 = vmatprep.mubr.msk.bf16.mxu0 %vm356_vm1, %v1031_v15  ;;  %974 = vmatpush3.bf16.msra.mxu0 %v1037_v13  ;;  %v878_v13 = vld [vmem:[%s1162_s9] sm:$0xff]  }
  0x2a   : > { %975 = vmatprep.subr.bf16.mxu0 %v1038_v17  ;;  %1012 = vmatpush3.bf16.msra.mxu1 %v1040_v19  ;;  %v1168_v15 = vld [vmem:[%s1222_s5] ss:$0 sm:$0xff] }
  0x2d   : > { %976 = vmatpush3.bf16.msra.mxu0 %v1038_v17  ;;  %v879_v17 = vunpack.c.l.bf16 %v878_v13 }
  0x2e   : > { %977 = vmatprep.subr.bf16.mxu0 %v1039_v18 }
  0x30   : > { %962 = vmatmul.mubr.msk.bf16.gmra.mxu0 %vm356_vm1, %v1032_v16  ;;  %v909_v16 = vld [vmem:[%s1162_s9 + $0x8] sm:$0xff]  }
  0x31   : > { %978 = vmatpush3.bf16.msra.mxu0 %v1039_v18 }
  0x32   : > { %979 = vmatprep.subr.bf16.mxu0 %v1040_v19 }
  0x35   : > { %980 = vmatpush3.bf16.msra.mxu0 %v1040_v19 }
  0xd8   : > { %v951_v20 = vpop.f32.mrf.mxu0 }
  0xd9   : > { %v428_v26 = vadd.f32 %v951_v20, %v846_v22  ;;  %v883_v20 = vunpack.c.l.bf16 %v909_v16 }
  0xda   : > { %v419_v21 = vpop.f32.mrf.mxu0 }
  0xdb   : > { %v420_v24 = vadd.f32 %v846_v22, %v419_v21  ;;  %v484_v33 = vmax.f32 %v428_v26, 0.0  ;;  %v880_v26 = vunpack.c.h.bf16 %v878_v13 }
  0xdc   : > { %v952_v23 = vpop.f32.mrf.mxu0 }
  0xdd   : > { %v431_v25 = vadd.f32 %v952_v23, %v846_v22  ;;  %v482_v31 = vmax.f32 %v420_v24, 0.0 }
  0xde   : > { %v422_v27 = vpop.f32.mrf.mxu0 }
  0xdf   : > { %v423_v28 = vadd.f32 %v846_v22, %v422_v27  ;;  %v485_v29 = vmax.f32 %v431_v25, 0.0  ;;  %v884_v25 = vunpack.c.h.bf16 %v909_v16 }
  0xe0   : > { %v955_v30 = vpop.f32.mrf.mxu0 }
  0xe1   : > { %v483_v32 = vmax.f32 %v423_v28, 0.0  ;;  %v499_v36 = vpack.c.bf16 %v485_v29, %v484_v33  ;;  %v444_v40 = vadd.f32 %v955_v30, %v846_v22  ;;  %v910_v28 = vld [vmem:[%s1162_s9 + $0x10] sm:$0xff]  }
  0xe2   : > { %v435_v34 = vpop.f32.mrf.mxu0 }
  0xe3   : > { %v498_v35 = vpack.c.bf16 %v483_v32, %v482_v31  ;;  %v436_v38 = vadd.f32 %v846_v22, %v435_v34  ;;  %v488_v47 = vmax.f32 %v444_v40, 0.0  ;;  %v911_v31 = vld [vmem:[%s1162_s9 + $0x18] sm:$0xff]  }
  0xe4   : > { %v956_v37 = vpop.f32.mrf.mxu0 }
  0xe5   : > { %v447_v39 = vadd.f32 %v956_v37, %v846_v22  ;;  %981 = vmatprep.mubr.bf16.mxu0 %v498_v35  ;;  %v486_v45 = vmax.f32 %v436_v38, 0.0  ;;  %v891_v37 = vunpack.c.l.bf16 %v911_v31 }
  0xe6   : > { %v438_v41 = vpop.f32.mrf.mxu0  ;;  %982 = vmatmul.mubr.bf16.vlgmr.msra.gmra.mxu0 %v499_v36  ;;  %v887_v36 = vunpack.c.l.bf16 %v910_v28 }
  0xe7   : > { %v439_v42 = vadd.f32 %v846_v22, %v438_v41  ;;  %v489_v43 = vmax.f32 %v447_v39, 0.0 }
  0xe8   : > { %v959_v44 = vpop.f32.mrf.mxu0 }
  0xe9   : > { %v487_v46 = vmax.f32 %v439_v42, 0.0  ;;  %v501_v50 = vpack.c.bf16 %v489_v43, %v488_v47  ;;  %v460_v54 = vadd.f32 %v959_v44, %v846_v22 }
  0xea   : > { %v451_v48 = vpop.f32.mrf.mxu0 }
  0xeb   : > { %v500_v49 = vpack.c.bf16 %v487_v46, %v486_v45  ;;  %v452_v52 = vadd.f32 %v846_v22, %v451_v48  ;;  %v492_v61 = vmax.f32 %v460_v54, 0.0  ;;  %v892_v45 = vunpack.c.h.bf16 %v911_v31 }
  0xec   : > { %v960_v51 = vpop.f32.mrf.mxu0  ;;  %v888_v46 = vunpack.c.h.bf16 %v910_v28 }
  0xed   : > { %v463_v53 = vadd.f32 %v960_v51, %v846_v22  ;;  %985 = vmatprep.mubr.bf16.mxu1 %v500_v49  ;;  %v490_v59 = vmax.f32 %v452_v52, 0.0 }
  0xee   : > { %v454_v55 = vpop.f32.mrf.mxu0  ;;  %986 = vmatmul.mubr.bf16.vlgmr.msra.gmra.mxu1 %v501_v50 }
  0xef   : > { %v455_v56 = vadd.f32 %v846_v22, %v454_v55  ;;  %v493_v57 = vmax.f32 %v463_v53, 0.0  ;;  %v912_v53 = vld [vmem:[%s1162_s9 + $0x20] sm:$0xff]  }
  0xf0   : > { %v963_v58 = vpop.f32.mrf.mxu0 }
  0xf1   : > { %v491_v60 = vmax.f32 %v455_v56, 0.0  ;;  %v503_v0 = vpack.c.bf16 %v493_v57, %v492_v61  ;;  %v476_v4 = vadd.f32 %v963_v58, %v846_v22  ;;  %v913_v58 = vld [vmem:[%s1162_s9 + $0x28] sm:$0xff]  }
  0xf2   : > { %v467_v62 = vpop.f32.mrf.mxu0 }
  0xf3   : > { %v502_v63 = vpack.c.bf16 %v491_v60, %v490_v59  ;;  %v468_v2 = vadd.f32 %v846_v22, %v467_v62  ;;  %v496_v10 = vmax.f32 %v476_v4, 0.0 }
  0xf4   : > { %v964_v1 = vpop.f32.mrf.mxu0 }
  0xf5   : > { %v479_v3 = vadd.f32 %v964_v1, %v846_v22  ;;  %989 = vmatprep.mubr.bf16.mxu1 %v502_v63  ;;  %v494_v8 = vmax.f32 %v468_v2, 0.0 }
  0xf6   : > { %v470_v5 = vpop.f32.mrf.mxu0  ;;  %990 = vmatmul.mubr.bf16.gmra.mxu1 %v503_v0  ;;  %v895_v0 = vunpack.c.l.bf16 %v912_v53 }
  0xf7   : > { %v471_v6 = vadd.f32 %v846_v22, %v470_v5  ;;  %v497_v7 = vmax.f32 %v479_v3, 0.0  ;;  %v899_v3 = vunpack.c.l.bf16 %v913_v58 }
  0xf9   : > { %v495_v9 = vmax.f32 %v471_v6, 0.0  ;;  %v505_v12 = vpack.c.bf16 %v497_v7, %v496_v10 }
  0xfb   : > { %v504_v11 = vpack.c.bf16 %v495_v9, %v494_v8 }
  0xfd   : > { %993 = vmatprep.mubr.bf16.mxu1 %v504_v11  ;;  %v900_v11 = vunpack.c.h.bf16 %v913_v58 }
  0xfe   : > { %994 = vmatmul.mubr.bf16.gmra.mxu1 %v505_v12  ;;  %v896_v12 = vunpack.c.h.bf16 %v912_v53 }
 0x1a6   : > { %v983_v14 = vpop.f32.mrf.mxu0 }
 0x1a7   : > { %v620_v19 = vadd.f32 %v983_v14, %v1168_v15 }
 0x1a8   : > { %v611_v18 = vpop.f32.mrf.mxu0 }
 0x1a9   : > { %v612_v21 = vadd.f32 %v1168_v15, %v611_v18  ;;  %v708_v29 = vsub.f32 %v620_v19, %v883_v20 }
 0x1aa   : > { %v984_v22 = vpop.f32.mrf.mxu0 }
 0x1ab   : > { %v706_v23 = vsub.f32 %v612_v21, %v879_v17  ;;  %v623_v24 = vadd.f32 %v984_v22, %v1168_v15  ;;  %v724_v39 = vmul.f32 %v708_v29, %v708_v29  ;;  %v914_v21 = vld [vmem:[%s1162_s9 + $0x30] sm:$0xff]  }
 0x1ac   : > { %v614_v27 = vpop.f32.mrf.mxu0  ;;  %v903_v31 = vunpack.c.l.bf16 %v914_v21 }
 0x1ad   : > { %v615_v30 = vadd.f32 %v1168_v15, %v614_v27  ;;  %v722_v32 = vmul.f32 %v706_v23, %v706_v23  ;;  %v709_v34 = vsub.f32 %v623_v24, %v884_v25  ;;  %v742_v54 = vsel %vm738_vm2, %v724_v39, 0.0  ;;  %v915_v25 = vld [vmem:[%s1162_s9 + $0x38] sm:$0xff]  }
 0x1ae   : > { %v987_v33 = vpop.f32.mrf.mxu1 }
 0x1af   : > { %v707_v35 = vsub.f32 %v615_v30, %v880_v26  ;;  %v636_v41 = vadd.f32 %v987_v33, %v1168_v15  ;;  %v739_v43 = vsel %vm738_vm2, %v722_v32, 0.0  ;;  %v725_v47 = vmul.f32 %v709_v34, %v709_v34 }
 0x1b0   : > { %v627_v38 = vpop.f32.mrf.mxu1  ;;  %v907_v34 = vunpack.c.l.bf16 %v915_v25 }
 0x1b1   : > { %v723_v40 = vmul.f32 %v707_v35, %v707_v35  ;;  %v628_v42 = vadd.f32 %v1168_v15, %v627_v38  ;;  %v712_v55 = vsub.f32 %v636_v41, %v891_v37  ;;  %v744_v61 = vsel %vm738_vm2, %v725_v47, 0.0 }
 0x1b2   : > { %v988_v44 = vpop.f32.mrf.mxu1 }
 0x1b3   : > { %v740_v48 = vsel %vm738_vm2, %v723_v40, 0.0  ;;  %v710_v49 = vsub.f32 %v628_v42, %v887_v36  ;;  %v639_v50 = vadd.f32 %v988_v44, %v1168_v15  ;;  %v728_v5 = vmul.f32 %v712_v55, %v712_v55 }
 0x1b4   : > { %v741_v51 = vadd.f32 %v740_v48, %v739_v43  ;;  %v630_v52 = vpop.f32.mrf.mxu1  ;;  %v908_v42 = vunpack.c.h.bf16 %v915_v25  ;;  %v904_v43 = vunpack.c.h.bf16 %v914_v21 }
 0x1b5   : > { %v726_v56 = vmul.f32 %v710_v49, %v710_v49  ;;  %v631_v57 = vadd.f32 %v1168_v15, %v630_v52  ;;  %v713_v62 = vsub.f32 %v639_v50, %v892_v45  ;;  %v750_v22 = vsel %vm738_vm2, %v728_v5, 0.0 }
 0x1b6   : > { %v743_v59 = vadd.f32 %v742_v54, %v741_v51  ;;  %v991_v60 = vpop.f32.mrf.mxu1 }
 0x1b7   : > { %v711_v63 = vsub.f32 %v631_v57, %v888_v46  ;;  %v652_v2 = vadd.f32 %v991_v60, %v1168_v15  ;;  %v746_v6 = vsel %vm738_vm2, %v726_v56, 0.0  ;;  %v729_v13 = vmul.f32 %v713_v62, %v713_v62 }
 0x1b8   : > { %v745_v1 = vadd.f32 %v744_v61, %v743_v59  ;;  %v643_v4 = vpop.f32.mrf.mxu1 }
 0x1b9   : > { %v727_v7 = vmul.f32 %v711_v63, %v711_v63  ;;  %v644_v8 = vadd.f32 %v1168_v15, %v643_v4  ;;  %v716_v19 = vsub.f32 %v652_v2, %v899_v3  ;;  %v752_v28 = vsel %vm738_vm2, %v729_v13, 0.0 }
 0x1ba   : > { %v747_v9 = vadd.f32 %v746_v6, %v745_v1  ;;  %v992_v10 = vpop.f32.mrf.mxu1 }
 0x1bb   : > { %v748_v14 = vsel %vm738_vm2, %v727_v7, 0.0  ;;  %v714_v16 = vsub.f32 %v644_v8, %v895_v0  ;;  %v655_v17 = vadd.f32 %v992_v10, %v1168_v15  ;;  %v732_v32 = vmul.f32 %v716_v19, %v716_v19 }
 0x1bc   : > { %v749_v18 = vadd.f32 %v748_v14, %v747_v9  ;;  %v646_v20 = vpop.f32.mrf.mxu1 }
 0x1bd   : > { %v730_v23 = vmul.f32 %v714_v16, %v714_v16  ;;  %v647_v24 = vadd.f32 %v1168_v15, %v646_v20  ;;  %v717_v29 = vsub.f32 %v655_v17, %v900_v11  ;;  %v758_v50 = vsel %vm738_vm2, %v732_v32, 0.0 }
 0x1be   : > { %v751_v26 = vadd.f32 %v750_v22, %v749_v18  ;;  %v995_v27 = vpop.f32.mrf.mxu1 }
 0x1bf   : > { %v715_v30 = vsub.f32 %v647_v24, %v896_v12  ;;  %v754_v36 = vsel %vm738_vm2, %v730_v23, 0.0  ;;  %v668_v38 = vadd.f32 %v995_v27, %v1168_v15  ;;  %v733_v44 = vmul.f32 %v717_v29, %v717_v29 }
 0x1c0   : > { %v753_v33 = vadd.f32 %v752_v28, %v751_v26  ;;  %v659_v35 = vpop.f32.mrf.mxu1 }
 0x1c1   : > { %v731_v37 = vmul.f32 %v715_v30, %v715_v30  ;;  %v660_v39 = vadd.f32 %v1168_v15, %v659_v35  ;;  %v720_v51 = vsub.f32 %v668_v38, %v907_v34  ;;  %v760_v55 = vsel %vm738_vm2, %v733_v44, 0.0 }
 0x1c2   : > { %v755_v40 = vadd.f32 %v754_v36, %v753_v33  ;;  %v996_v41 = vpop.f32.mrf.mxu1 }
 0x1c3   : > { %v756_v45 = vsel %vm738_vm2, %v731_v37, 0.0  ;;  %v718_v46 = vsub.f32 %v660_v39, %v903_v31  ;;  %v671_v47 = vadd.f32 %v996_v41, %v1168_v15  ;;  %v736_v59 = vmul.f32 %v720_v51, %v720_v51 }
 0x1c4   : > { %v757_v48 = vadd.f32 %v756_v45, %v755_v40  ;;  %v662_v49 = vpop.f32.mrf.mxu1 }
 0x1c5   : > { %v734_v52 = vmul.f32 %v718_v46, %v718_v46  ;;  %v663_v53 = vadd.f32 %v1168_v15, %v662_v49  ;;  %v721_v56 = vsub.f32 %v671_v47, %v908_v42  ;;  %v766_v2 = vsel %vm738_vm2, %v736_v59, 0.0 }
 0x1c6   : > { %v759_v54 = vadd.f32 %v758_v50, %v757_v48 }
 0x1c7   : > { %v719_v57 = vsub.f32 %v663_v53, %v904_v43  ;;  %v762_v60 = vsel %vm738_vm2, %v734_v52, 0.0  ;;  %v737_v63 = vmul.f32 %v721_v56, %v721_v56 }
 0x1c8   : > { %v761_v58 = vadd.f32 %v760_v55, %v759_v54 }
 0x1c9   : > { %v735_v61 = vmul.f32 %v719_v57, %v719_v57  ;;  %v768_v3 = vsel %vm738_vm2, %v737_v63, 0.0 }
 0x1ca   : > { %v763_v62 = vadd.f32 %v762_v60, %v761_v58 }
 0x1cb   : > { %v764_v0 = vsel %vm738_vm2, %v735_v61, 0.0 }
 0x1cc   : > { %v765_v1 = vadd.f32 %v764_v0, %v763_v62 }
 0x1ce   : > { %v767_v15 = vadd.f32 %v766_v2, %v765_v1 }
 0x1d0   : > { %v769_v4 = vadd.f32 %v768_v3, %v767_v15 }
 0x1d2   : > { %v770_v5 = vrot.slane %v769_v4, 4 }
 0x1d4   : > { %v771_v6 = vadd.f32 %v770_v5, %v769_v4 }
 0x1d6   : > { %v772_v7 = vrot.slane %v771_v6, 2 }
 0x1d8   : > { %v773_v8 = vadd.f32 %v772_v7, %v771_v6 }
 0x1da   : > { %v774_v9 = vrot.slane %v773_v8, 1 }
 0x1dc   : > { %v775_v10 = vadd.f32 %v774_v9, %v773_v8 }
 0x1de   : > { %777 = vst.msk [vmem:[%s271_s13] sm:$0x1] %vm776_vm3, %v775_v10 }
 0x1df PF: > { %s16_s21 = sadd.s32 1, %s1047_s21  }
 0x1e0   : > { %p13_p5 = scmp.ge.s32.totalorder %s16_s21, 6  }
 0x1e2   :  { %15 = sbr.rel (!%p13_p5) target bundleno = 1 (0x1), region = 77 }

</bundles_post_ra>
